<compile_context>
chip_gen: v7x
topology: tpu7x:2x2x1
jax: 0.10.0
libtpu: 0.0.40
codegen_flags: <defaults>
</compile_context>

<pallas_src>
import functools
import math

import jax
import jax.numpy as jnp
from jax.experimental import pallas as pl
from jax.experimental.pallas import tpu as pltpu


# ----------------------------------------------------------------------------
# Helpers
# ----------------------------------------------------------------------------
def _vmem_budget_bytes():
    """Generation-aware VMEM budget (leave headroom for compiler scratch)."""
    cap = None
    try:
        cap = pltpu.get_tpu_info().vmem_capacity_bytes
    except Exception:
        cap = None
    if cap is None or cap <= 64 * 1024 * 1024:
        # v7x: 64 MiB per TensorCore -> never request more than ~52 MiB.
        return 52 * 1024 * 1024
    # v5e / v6e: 128 MiB physical -> allow ~104 MiB.
    return min(cap - 24 * 1024 * 1024, 104 * 1024 * 1024)


def _pick_tile(n, target, multiples):
    """Largest divisor of n that is <= target and a multiple of one of
    `multiples` (tried in order); falls back to n itself (full extent)."""
    t = min(target, n)
    for mult in multiples:
        cand = (t // mult) * mult
        while cand >= mult:
            if n % cand == 0:
                return cand
            cand -= mult
    return n


def prepare_adjacency(adj, dtype=jnp.bfloat16):
    """Cast a (reused) normalized adjacency once, outside the per-call path."""
    return adj.astype(dtype)


# ----------------------------------------------------------------------------
# Stage 1: per-node feature transform  -> H_miu, H_sigma  (bf16, lane-dense)
# ----------------------------------------------------------------------------
def _transform_kernel(gamma_ref, feat_ref, wm_ref, ws_ref, hmiu_ref, hsig_ref):
    gamma = gamma_ref[0]                                             # SMEM scalar
    x = feat_ref[...]                                                # bf16 [tr, F_in]
    z_miu = jnp.dot(x, wm_ref[...], preferred_element_type=jnp.float32)
    z_sig = jnp.dot(x, ws_ref[...], preferred_element_type=jnp.float32)
    # ELU(alpha=1); clamp before exp so the dead branch never produces inf.
    miu = jnp.where(z_miu > 0, z_miu, jnp.exp(jnp.minimum(z_miu, 0.0)) - 1.0)
    sigma = jnp.maximum(z_sig, 0.0)                                  # ReLU
    att = jnp.exp(-gamma * sigma)
    hmiu_ref[...] = (miu * att).astype(hmiu_ref.dtype)
    hsig_ref[...] = (sigma * att * att).astype(hsig_ref.dtype)


# ----------------------------------------------------------------------------
# Stage 2: propagation  adj1 @ H_miu, adj2 @ H_sigma
#   * K-tiled, f32 accumulation directly into the (k-resident) output refs.
#   * H either fully VMEM-resident (sliced with pl.ds) or streamed as K-slabs.
# ----------------------------------------------------------------------------
def _propagate_kernel(adj1_ref, adj2_ref, hmiu_ref, hsig_ref,
                      miu_out_ref, sig_out_ref, *, kt, h_resident):
    k = pl.program_id(1)

    @pl.when(k == 0)
    def _():
        miu_out_ref[...] = jnp.zeros_like(miu_out_ref)
        sig_out_ref[...] = jnp.zeros_like(sig_out_ref)

    if h_resident:
        start = pl.multiple_of(k * kt, kt)
        hm = hmiu_ref[pl.ds(start, kt), :]
        hs = hsig_ref[pl.ds(start, kt), :]
    else:
        hm = hmiu_ref[...]
        hs = hsig_ref[...]

    miu_out_ref[...] += jnp.dot(adj1_ref[...], hm,
                                preferred_element_type=jnp.float32)
    sig_out_ref[...] += jnp.dot(adj2_ref[...], hs,
                                preferred_element_type=jnp.float32)


# ----------------------------------------------------------------------------
# Wrapper
# ----------------------------------------------------------------------------
def ggcl_f_forward(features, weight_miu, weight_sigma, adj_norm1, adj_norm2,
                   gamma=1.0, *, row_tile=1024, k_tile=2048, feat_tile=512,
                   adj_dtype=jnp.bfloat16):
    N, f_in = features.shape
    f_in2, f_out = weight_miu.shape
    assert f_in2 == f_in and weight_sigma.shape == (f_in, f_out)
    assert adj_norm1.shape == (N, N) and adj_norm2.shape == (N, N)
    assert N % 8 == 0, "N must be a multiple of 8"

    # Lane-dense width for H / outputs (MXU column width, unmasked vst).
    f_pad = max(((f_out + 127) // 128) * 128, 128)
    pad_cols = f_pad - f_out

    # ---- tile selection (legal (8,128) tiles that divide N) ----
    # kt is the lane dim of the adjacency blocks -> multiple of 128 (or N).
    kt = _pick_tile(N, k_tile, (128,))
    rt = _pick_tile(N, row_tile, (128, 16, 8))
    tr = _pick_tile(N, feat_tile, (128, 16, 8))

    # v7x: keep the parallel row-tile count even (>1) so both TCs stay busy.
    n_row = N // rt
    if n_row > 1 and n_row % 2 == 1 and rt % 16 == 0:
        rt //= 2

    # ---- VMEM budgeting (generation-aware) ----
    budget = _vmem_budget_bytes()
    adj_bytes = jnp.dtype(adj_dtype).itemsize

    def resident_est(rt_, kt_):
        return (2 * 2 * rt_ * kt_ * adj_bytes     # two adj streams, dbl-buffered
                + 2 * N * f_pad * 2               # resident bf16 H (single buf)
                + 2 * 2 * rt_ * f_pad * 4)        # two f32 outputs, dbl-buffered

    def streamed_est(rt_, kt_):
        return (2 * 2 * rt_ * kt_ * adj_bytes
                + 2 * 2 * kt_ * f_pad * 2         # H K-slabs, dbl-buffered
                + 2 * 2 * rt_ * f_pad * 4)

    h_resident = resident_est(rt, kt) <= budget
    if not h_resident:
        # Shrink the adjacency tiles until the streamed layout fits.
        while streamed_est(rt, kt) > budget and kt > 128 and (kt // 2) % 128 == 0:
            kt //= 2
        while streamed_est(rt, kt) > budget and rt > 8 and (rt // 2) % 8 == 0:
            rt //= 2
        # Re-check residency with the (possibly) smaller tiles.
        h_resident = resident_est(rt, kt) <= budget

    est = resident_est(rt, kt) if h_resident else streamed_est(rt, kt)
    vmem_limit = int(min(budget, max(2 * est, 32 * 1024 * 1024)))

    # ---- Stage 1: transform (bf16 MXU operands, f32 accumulation) ----
    feats_bf = features.astype(jnp.bfloat16)
    wm_p = jnp.pad(weight_miu.astype(jnp.float32),
                   ((0, 0), (0, pad_cols))).astype(jnp.bfloat16)
    ws_p = jnp.pad(weight_sigma.astype(jnp.float32),
                   ((0, 0), (0, pad_cols))).astype(jnp.bfloat16)
    gamma_arr = jnp.asarray([gamma], dtype=jnp.float32)

    transform = pl.pallas_call(
        _transform_kernel,
        out_shape=(jax.ShapeDtypeStruct((N, f_pad), jnp.bfloat16),
                   jax.ShapeDtypeStruct((N, f_pad), jnp.bfloat16)),
        grid_spec=pltpu.PrefetchScalarGridSpec(
            num_scalar_prefetch=0,
            grid=(N // tr,),
            in_specs=[
                pl.BlockSpec(memory_space=pltpu.MemorySpace.SMEM),  # gamma (1,)
                pl.BlockSpec((tr, f_in), lambda i: (i, 0)),         # features
                pl.BlockSpec((f_in, f_pad), lambda i: (0, 0)),      # W_miu (padded)
                pl.BlockSpec((f_in, f_pad), lambda i: (0, 0)),      # W_sigma (padded)
            ],
            out_specs=[
                pl.BlockSpec((tr, f_pad), lambda i: (i, 0)),
                pl.BlockSpec((tr, f_pad), lambda i: (i, 0)),
            ],
        ),
        compiler_params=pltpu.CompilerParams(
            dimension_semantics=("parallel",)),
    )
    h_miu, h_sigma = transform(gamma_arr, feats_bf, wm_p, ws_p)

    # ---- Stage 2: propagation ----
    # NOTE: callers that reuse adj across layers/steps should pre-cast once
    # with prepare_adjacency(); this per-call cast is a no-op for bf16 inputs.
    adj1 = adj_norm1 if adj_norm1.dtype == adj_dtype else adj_norm1.astype(adj_dtype)
    adj2 = adj_norm2 if adj_norm2.dtype == adj_dtype else adj_norm2.astype(adj_dtype)

    if h_resident:
        h_spec = pl.BlockSpec((N, f_pad), lambda i, k: (0, 0))   # DMA'd once
    else:
        h_spec = pl.BlockSpec((kt, f_pad), lambda i, k: (k, 0))  # K-slab stream

    propagate = pl.pallas_call(
        functools.partial(_propagate_kernel, kt=kt, h_resident=h_resident),
        out_shape=(jax.ShapeDtypeStruct((N, f_pad), jnp.float32),
                   jax.ShapeDtypeStruct((N, f_pad), jnp.float32)),
        grid_spec=pltpu.PrefetchScalarGridSpec(
            num_scalar_prefetch=0,
            grid=(N // rt, N // kt),                              # reduction last
            in_specs=[
                pl.BlockSpec((rt, kt), lambda i, k: (i, k)),      # adj_norm1 tile
                pl.BlockSpec((rt, kt), lambda i, k: (i, k)),      # adj_norm2 tile
                h_spec,                                           # H_miu
                h_spec,                                           # H_sigma
            ],
            out_specs=[
                pl.BlockSpec((rt, f_pad), lambda i, k: (i, 0)),   # k-resident acc
                pl.BlockSpec((rt, f_pad), lambda i, k: (i, 0)),
            ],
        ),
        compiler_params=pltpu.CompilerParams(
            dimension_semantics=("parallel", "arbitrary"),
            vmem_limit_bytes=vmem_limit,
        ),
    )
    miu_out_p, sigma_out_p = propagate(adj1, adj2, h_miu, h_sigma)

    # Padded weight columns are zero -> padded output columns are exactly zero.
    if f_pad != f_out:
        miu_out_p = miu_out_p[:, :f_out]
        sigma_out_p = sigma_out_p[:, :f_out]
    return miu_out_p, sigma_out_p


# ----------------------------------------------------------------------------
# Reference / demo
# ----------------------------------------------------------------------------
def _xavier_uniform(key, shape):
    fan_in, fan_out = shape
    bound = math.sqrt(6.0 / (fan_in + fan_out))
    return jax.random.uniform(key, shape, jnp.float32, -bound, bound)


def _reference(features, wm, ws, adj1, adj2, gamma=1.0):
    z_miu = features @ wm
    miu = jnp.where(z_miu > 0, z_miu, jnp.exp(jnp.minimum(z_miu, 0.0)) - 1.0)
    sigma = jnp.maximum(features @ ws, 0.0)
    att = jnp.exp(-gamma * sigma)
    return adj1 @ (miu * att), adj2 @ (sigma * att * att)


if __name__ == "__main__":
    # Small, TPU-friendly shapes consistent with the module's forward.
    N, F_IN, F_OUT = 128, 64, 32
    gamma = 1.0

    key = jax.random.PRNGKey(0)
    k_feat, k_wm, k_ws, k_a1, k_a2 = jax.random.split(key, 5)

    features = jax.random.normal(k_feat, (N, F_IN), jnp.float32)
    weight_miu = _xavier_uniform(k_wm, (F_IN, F_OUT))
    weight_sigma = _xavier_uniform(k_ws, (F_IN, F_OUT))
    # Synthetic (dense) row-normalized adjacency matrices.
    adj_norm1 = jax.nn.softmax(jax.random.normal(k_a1, (N, N), jnp.float32), axis=-1)
    adj_norm2 = jax.nn.softmax(jax.random.normal(k_a2, (N, N), jnp.float32), axis=-1)

    # Hoisted, one-time bf16 cast of the (reusable) adjacencies.
    adj1_b = prepare_adjacency(adj_norm1, jnp.bfloat16)
    adj2_b = prepare_adjacency(adj_norm2, jnp.bfloat16)

    # TODO(synk): F.dropout with training=True (stochastic masking) is omitted;
    # the kernel implements the eval-mode forward where dropout is the identity.

    miu_out, sigma_out = ggcl_f_forward(
        features, weight_miu, weight_sigma, adj1_b, adj2_b, gamma)
    jax.block_until_ready((miu_out, sigma_out))

    ref_miu, ref_sigma = _reference(
        features, weight_miu, weight_sigma, adj_norm1, adj_norm2, gamma)

    assert miu_out.shape == (N, F_OUT) and sigma_out.shape == (N, F_OUT)
    # Adjacency / H / features are streamed in bf16 (intentional perf tradeoff)
    # with f32 accumulation, so compare against the f32 reference with a bf16
    # tolerance.
    assert jnp.allclose(miu_out, ref_miu, atol=3e-2, rtol=3e-2), \
        float(jnp.max(jnp.abs(miu_out - ref_miu)))
    assert jnp.allclose(sigma_out, ref_sigma, atol=3e-2, rtol=3e-2), \
        float(jnp.max(jnp.abs(sigma_out - ref_sigma)))

    print("KERNEL_OK")
</pallas_src>

<mosaic_0001>
module attributes {stable_mosaic.version = 11 : i64} {
  func.func @_transform_kernel(%arg0: i32, %arg1: memref<1xf32, #tpu.memory_space<smem>>, %arg2: memref<128x64xbf16, #tpu.memory_space<vmem>>, %arg3: memref<64x128xbf16, #tpu.memory_space<vmem>>, %arg4: memref<64x128xbf16, #tpu.memory_space<vmem>>, %arg5: memref<128x128xbf16, #tpu.memory_space<vmem>>, %arg6: memref<128x128xbf16, #tpu.memory_space<vmem>>) attributes {dimension_semantics = [#tpu.dimension_semantics<parallel>], iteration_bounds = array<i64: 1>, scalar_prefetch = 0 : i64, scratch_operands = 0 : i64, tpu.core_type = #tpu.core_type<tc>, window_params = [{transform_indices = @transform_0, window_bounds = array<i64: 1>}, {transform_indices = @transform_1, window_bounds = array<i64: 128, 64>}, {pipeline_mode = #tpu.pipeline_mode<synchronous>, transform_indices = @transform_2, window_bounds = array<i64: 64, 128>}, {pipeline_mode = #tpu.pipeline_mode<synchronous>, transform_indices = @transform_3, window_bounds = array<i64: 64, 128>}, {transform_indices = @transform_4, window_bounds = array<i64: 128, 128>}, {transform_indices = @transform_5, window_bounds = array<i64: 128, 128>}]} {
    %c0 = arith.constant 0 : index
    %0 = memref.load %arg1[%c0] : memref<1xf32, #tpu.memory_space<smem>>
    %c0_0 = arith.constant 0 : index
    %c0_1 = arith.constant 0 : index
    %1 = vector.load %arg2[%c0_0, %c0_1] : memref<128x64xbf16, #tpu.memory_space<vmem>>, vector<128x64xbf16>
    %c0_2 = arith.constant 0 : index
    %c0_3 = arith.constant 0 : index
    %2 = vector.load %arg3[%c0_2, %c0_3] : memref<64x128xbf16, #tpu.memory_space<vmem>>, vector<64x128xbf16>
    %cst = arith.constant dense<0.000000e+00> : vector<128x128xf32>
    %3 = tpu.matmul %1, %2, %cst {dimension_numbers = #tpu.dot_dimension_numbers<[1], [0], [0], [1], [0, 0, 1, 1], [], []>} : vector<128x64xbf16>, vector<64x128xbf16>, vector<128x128xf32> -> vector<128x128xf32>
    %c0_4 = arith.constant 0 : index
    %c0_5 = arith.constant 0 : index
    %4 = vector.load %arg4[%c0_4, %c0_5] : memref<64x128xbf16, #tpu.memory_space<vmem>>, vector<64x128xbf16>
    %cst_6 = arith.constant dense<0.000000e+00> : vector<128x128xf32>
    %5 = tpu.matmul %1, %4, %cst_6 {dimension_numbers = #tpu.dot_dimension_numbers<[1], [0], [0], [1], [0, 0, 1, 1], [], []>} : vector<128x64xbf16>, vector<64x128xbf16>, vector<128x128xf32> -> vector<128x128xf32>
    %cst_7 = arith.constant 0.000000e+00 : f32
    %6 = vector.broadcast %cst_7 : f32 to vector<128x128xf32>
    %7 = arith.cmpf ogt, %3, %6 : vector<128x128xf32>
    %cst_8 = arith.constant 0.000000e+00 : f32
    %8 = vector.broadcast %cst_8 : f32 to vector<128x128xf32>
    %9 = arith.minimumf %3, %8 : vector<128x128xf32>
    %10 = math.exp %9 : vector<128x128xf32>
    %cst_9 = arith.constant 1.000000e+00 : f32
    %11 = vector.broadcast %cst_9 : f32 to vector<128x128xf32>
    %12 = arith.subf %10, %11 : vector<128x128xf32>
    %13 = arith.select %7, %3, %12 : vector<128x128xi1>, vector<128x128xf32>
    %cst_10 = arith.constant 0.000000e+00 : f32
    %14 = vector.broadcast %cst_10 : f32 to vector<128x128xf32>
    %15 = arith.maximumf %5, %14 : vector<128x128xf32>
    %cst_11 = arith.constant 0.000000e+00 : f32
    %16 = arith.subf %cst_11, %0 : f32
    %17 = vector.broadcast %16 : f32 to vector<128x128xf32>
    %18 = arith.mulf %17, %15 : vector<128x128xf32>
    %19 = math.exp %18 : vector<128x128xf32>
    %20 = arith.mulf %13, %19 : vector<128x128xf32>
    %21 = arith.truncf %20 : vector<128x128xf32> to vector<128x128xbf16>
    %c0_12 = arith.constant 0 : index
    %c0_13 = arith.constant 0 : index
    %22 = vector.load %arg5[%c0_12, %c0_13] : memref<128x128xbf16, #tpu.memory_space<vmem>>, vector<128x128xbf16>
    tpu.vector_store %arg5[%c0_12, %c0_13], %21 {strides = array<i32>} : memref<128x128xbf16, #tpu.memory_space<vmem>>, vector<128x128xbf16>,
    %23 = arith.mulf %15, %19 : vector<128x128xf32>
    %24 = arith.mulf %23, %19 : vector<128x128xf32>
    %25 = arith.truncf %24 : vector<128x128xf32> to vector<128x128xbf16>
    %c0_14 = arith.constant 0 : index
    %c0_15 = arith.constant 0 : index
    %26 = vector.load %arg6[%c0_14, %c0_15] : memref<128x128xbf16, #tpu.memory_space<vmem>>, vector<128x128xbf16>
    tpu.vector_store %arg6[%c0_14, %c0_15], %25 {strides = array<i32>} : memref<128x128xbf16, #tpu.memory_space<vmem>>, vector<128x128xbf16>,
    return
  }
  func.func @transform_0(%arg0: i32) -> i32 {
    %c0_i32 = arith.constant 0 : i32
    %c0_i32_0 = arith.constant 0 : i32
    return %c0_i32 : i32
  }
  func.func @transform_1(%arg0: i32) -> (i32, i32) {
    %c0_i32 = arith.constant 0 : i32
    %c0_i32_0 = arith.constant 0 : i32
    return %arg0, %c0_i32 : i32, i32
  }
  func.func @transform_2(%arg0: i32) -> (i32, i32) {
    %c0_i32 = arith.constant 0 : i32
    %c0_i32_0 = arith.constant 0 : i32
    %c0_i32_1 = arith.constant 0 : i32
    return %c0_i32, %c0_i32_0 : i32, i32
  }
  func.func @transform_3(%arg0: i32) -> (i32, i32) {
    %c0_i32 = arith.constant 0 : i32
    %c0_i32_0 = arith.constant 0 : i32
    %c0_i32_1 = arith.constant 0 : i32
    return %c0_i32, %c0_i32_0 : i32, i32
  }
  func.func @transform_4(%arg0: i32) -> (i32, i32) {
    %c0_i32 = arith.constant 0 : i32
    %c0_i32_0 = arith.constant 0 : i32
    return %arg0, %c0_i32 : i32, i32
  }
  func.func @transform_5(%arg0: i32) -> (i32, i32) {
    %c0_i32 = arith.constant 0 : i32
    %c0_i32_0 = arith.constant 0 : i32
    return %arg0, %c0_i32 : i32, i32
  }
}

</mosaic_0001>

<bundles_post_ra>
// kernel: tpu_custom_call.1
= control target key start
LH: loop header
LB: loop body
LE: loop exit
PB: predicated region body
PF: predicated region fallthrough
CT: control target
= control target key end

     0   :  { %12 = vsyncpa [#allocation4], 0  ;;  %vm112_vm0 = vcmask 523264   ;;  %s1558_s0 = inlined_call_operand.<no memory space> [shape: f32[1], index: 0, kind: input, shape index: {}]   ;;  %s1559_s1 = inlined_call_operand.vmem [shape: bf16[128,64], index: 1, kind: input, shape index: {}]   ;;  %s1560_s2 = inlined_call_operand.vmem [shape: bf16[64,128], index: 2, kind: input, shape index: {}]   ;;  %s1561_s3 = inlined_call_operand.vmem [shape: bf16[64,128], index: 3, kind: input, shape index: {}]   ;;  %s1562_s4 = inlined_call_operand.hbm [shape: bf16[128,128], index: 4, kind: output, shape index: {0}]   ;;  %s1563_s5 = inlined_call_operand.hbm [shape: bf16[128,128], index: 5, kind: output, shape index: {1}]  }
   0x1   :  { %v1047_v0 = vld [vmem:[%s1560_s2] sm:$0xff]   ;;  %v1049_v2 = vld [vmem:[%s1560_s2 + $0x8] sm:$0xff]   ;;  %v1051_v4 = vld [vmem:[%s1560_s2 + $0x10] sm:$0xff]  }
   0x2   :  { %v1048_v1 = vld [vmem:[%s1561_s3] sm:$0xff]   ;;  %995 = vmatprep.subr.bf16.mxu0 %v1047_v0  ;;  %v1050_v3 = vld [vmem:[%s1561_s3 + $0x8] sm:$0xff]   ;;  %v1052_v5 = vld [vmem:[%s1561_s3 + $0x10] sm:$0xff]  }
   0x3   :  { %1019 = vmatprep.subr.bf16.mxu1 %v1048_v1  ;;  %996 = vmatpush3.bf16.msra.mxu0 %v1047_v0  ;;  %v1053_v6 = vld [vmem:[%s1560_s2 + $0x18] sm:$0xff]   ;;  %v1055_v7 = vld [vmem:[%s1559_s1] sm:$0xff]   ;;  %v1056_v9 = vld [vmem:[%s1559_s1 + $0x8] sm:$0xff]  }
   0x4   :  { %1020 = vmatpush3.bf16.msra.mxu1 %v1048_v1  ;;  %997 = vmatprep.subr.bf16.mxu0 %v1049_v2  ;;  %v1054_v8 = vld [vmem:[%s1561_s3 + $0x18] sm:$0xff]   ;;  %v1057_v10 = vld [vmem:[%s1559_s1 + $0x10] sm:$0xff]  }
   0x5   :  { %1021 = vmatprep.subr.bf16.mxu1 %v1050_v3  ;;  %1003 = vmatprep.mubr.msk.bf16.mxu0 %vm112_vm0, %v1055_v7 }
   0x6   :  { %1027 = vmatprep.mubr.msk.bf16.mxu1 %vm112_vm0, %v1055_v7 }
   0x7   :  { %998 = vmatpush3.bf16.msra.mxu0 %v1049_v2 }
   0x8   :  { %1022 = vmatpush3.bf16.msra.mxu1 %v1050_v3  ;;  %999 = vmatprep.subr.bf16.mxu0 %v1051_v4 }
   0x9   :  { %1023 = vmatprep.subr.bf16.mxu1 %v1052_v5 }
   0xb   :  { %1000 = vmatpush3.bf16.msra.mxu0 %v1051_v4 }
   0xc   :  { %1024 = vmatpush3.bf16.msra.mxu1 %v1052_v5  ;;  %1001 = vmatprep.subr.bf16.mxu0 %v1053_v6 }
   0xd   :  { %1025 = vmatprep.subr.bf16.mxu1 %v1054_v8 }
   0xf   :  { %1002 = vmatpush3.bf16.msra.mxu0 %v1053_v6 }
  0x10   :  { %1026 = vmatpush3.bf16.msra.mxu1 %v1054_v8 }
  0x11   :  { %13 = vsyncpa [#allocation6], 0  ;;  %v1058_v11 = vld [vmem:[%s1559_s1 + $0x18] sm:$0xff]   ;;  %v1059_v12 = vld [vmem:[%s1559_s1 + $0x20] sm:$0xff]   ;;  %s475_s25 = ssub.f32 0.0, %s1558_s0  ;;  %s1175_s0 = smov [#allocation3]  }
  0x12   :  { %1004 = vmatmul.mubr.msk.bf16.vlgmr.msra.gmra.mrb[0].mxu0 %vm112_vm0, %v1056_v9  ;;  %v1060_v13 = vld [vmem:[%s1559_s1 + $0x28] sm:$0xff]   ;;  %v1061_v14 = vld [vmem:[%s1559_s1 + $0x30] sm:$0xff]   ;;  %v1062_v15 = vld [vmem:[%s1559_s1 + $0x38] sm:$0xff]   ;;  %s738_s1 = sshll.u32 %s1175_s0, 4  ;;  %s1176_s26 = smov [#allocation5]   ;;  %s739_s1 = int_to_ptr.vmem [resolvable:$true] %s738_s1 }
  0x13   :  { %1028 = vmatmul.mubr.msk.bf16.vlgmr.msra.gmra.mrb[0].mxu1 %vm112_vm0, %v1056_v9  ;;  %1007 = vmatprep.mubr.msk.bf16.mxu0 %vm112_vm0, %v1057_v10  ;;  %v1281_v19 = vstv %s475_s25  ;;  %s750_s27 = sshll.u32 %s1176_s26, 4  ;;  %s1127_s28 = scalar_lea.vmem %s739_s1, 1024  ;;  %s1527_s27 = int_to_ptr.vmem [resolvable:$true] %s750_s27 }
  0x14   :  { %1031 = vmatprep.mubr.msk.bf16.mxu1 %vm112_vm0, %v1057_v10  ;;  %p1128_p0 = scmp.ne.s32.totalorder %s739_s1, %s1127_s28  ;;  %p1132_p1 = scmp.lt.s32.totalorder %s739_s1, %s739_s1 }
  0x15   :  { %p1133_p2 = scmp.lt.s32.totalorder %s1127_s28, %s1127_s28 }
  0x17   :  { %p1134_p3 = por %p1133_p2, %p1132_p1 }
  0x19   :  { %p1135_p4 = pnand %p1134_p3, %p1128_p0 }
  0x1a   :  { %1008 = vmatmul.mubr.msk.bf16.gmra.mrb[4].mxu0 %vm112_vm0, %v1058_v11 }
  0x1b   :  { %1032 = vmatmul.mubr.msk.bf16.gmra.mrb[4].mxu1 %vm112_vm0, %v1058_v11  ;;  %1011 = vmatprep.mubr.msk.bf16.mxu0 %vm112_vm0, %v1059_v12 }
  0x1c   :  { %1035 = vmatprep.mubr.msk.bf16.mxu1 %vm112_vm0, %v1059_v12 }
  0x22   :  { %1012 = vmatmul.mubr.msk.bf16.gmra.mrb[8].mxu0 %vm112_vm0, %v1060_v13 }
  0x23   :  { %1036 = vmatmul.mubr.msk.bf16.gmra.mrb[8].mxu1 %vm112_vm0, %v1060_v13  ;;  %1015 = vmatprep.mubr.msk.bf16.mxu0 %vm112_vm0, %v1061_v14 }
  0x24   :  { %1039 = vmatprep.mubr.msk.bf16.mxu1 %vm112_vm0, %v1061_v14 }
  0x2a   :  { %1016 = vmatmul.mubr.msk.bf16.gmra.mrb[12].mxu0 %vm112_vm0, %v1062_v15 }
  0x2b   :  { %1040 = vmatmul.mubr.msk.bf16.gmra.mrb[12].mxu1 %vm112_vm0, %v1062_v15 }
  0xe5   :  { %v1276_v16 = vpop.f32.mrb[0].mxu0 }
  0xe6   :  { %v381_v17 = vmin.f32 %v1276_v16, 0.0  ;;  %v1279_v18 = vpop.f32.mrb[0].mxu1  ;;  %v1283_v20 = vpop.f32.mrb[1].mxu0  ;;  %vm365_vm1 = vcmp.gt.f32.partialorder %v1276_v16, 0.0 }
  0xe7   :  { %v461_v21 = vmax.f32 %v1279_v18, 0.0  ;;  %v379_v22 = vmin.f32 %v1283_v20, 0.0  ;;  %v1287_v23 = vpop.f32.mrb[1].mxu1  ;;  %v1289_v24 = vpop.f32.mrb[2].mxu0  ;;  %vm363_vm2 = vcmp.gt.f32.partialorder %v1283_v20, 0.0 }
  0xe8   :  { %v399_v25 = vmul.f32 1.442695, %v381_v17  ;;  %v459_v26 = vmax.f32 %v1287_v23, 0.0  ;;  %v382_v27 = vmin.f32 %v1289_v24, 0.0  ;;  %v1293_v28 = vpop.f32.mrb[2].mxu1  ;;  %v1299_v32 = vpop.f32.mrb[3].mxu0 }
  0xe9   :  { %v479_v29 = vmul.f32 %v1281_v19, %v461_v21  ;;  %v395_v30 = vmul.f32 1.442695, %v379_v22  ;;  %v462_v31 = vmax.f32 %v1293_v28, 0.0  ;;  %v1301_v33 = vpop.f32.mrb[3].mxu1  ;;  %v380_v38 = vmin.f32 %v1299_v32, 0.0 }
  0xea   :  { %1063 = vpow2.f32 %v399_v25  ;;  %v477_v34 = vmul.f32 %v1281_v19, %v459_v26  ;;  %v401_v35 = vmul.f32 1.442695, %v382_v27  ;;  %v460_v40 = vmax.f32 %v1301_v33, 0.0 }
  0xeb   :  { %v497_v36 = vmul.f32 1.442695, %v479_v29  ;;  %1065 = vpow2.f32 %v395_v30  ;;  %v480_v37 = vmul.f32 %v1281_v19, %v462_v31  ;;  %v397_v42 = vmul.f32 1.442695, %v380_v38 }
  0xec   :  { %v493_v39 = vmul.f32 1.442695, %v477_v34  ;;  %1067 = vpow2.f32 %v401_v35  ;;  %v478_v44 = vmul.f32 %v1281_v19, %v460_v40  ;;  %vm366_vm3 = vcmp.gt.f32.partialorder %v1289_v24, 0.0 }
  0xed   :  { %1069 = vpow2.f32 %v497_v36  ;;  %v499_v41 = vmul.f32 1.442695, %v480_v37  ;;  %v1311_v43 = vpop.f32.mrb[4].mxu0  ;;  %vm364_vm4 = vcmp.gt.f32.partialorder %v1299_v32, 0.0 }
  0xee   :  { %1071 = vpow2.f32 %v493_v39  ;;  %v385_v45 = vmin.f32 %v1311_v43, 0.0  ;;  %v1317_v46 = vpop.f32.mrb[4].mxu1  ;;  %v1319_v47 = vpop.f32.mrb[5].mxu0  ;;  %v495_v52 = vmul.f32 1.442695, %v478_v44  ;;  %vm369_vm5 = vcmp.gt.f32.partialorder %v1311_v43, 0.0 }
  0xef   :  { %1073 = vpow2.f32 %v499_v41  ;;  %v465_v48 = vmax.f32 %v1317_v46, 0.0  ;;  %v383_v49 = vmin.f32 %v1319_v47, 0.0  ;;  %v1323_v50 = vpop.f32.mrb[5].mxu1  ;;  %v1325_v51 = vpop.f32.mrb[6].mxu0  ;;  %vm367_vm6 = vcmp.gt.f32.partialorder %v1319_v47, 0.0 }
  0xf0   :  { %1075 = vpow2.f32 %v397_v42  ;;  %v407_v53 = vmul.f32 1.442695, %v385_v45  ;;  %v463_v54 = vmax.f32 %v1323_v50, 0.0  ;;  %v1328_v55 = vpop.f32.mrb[6].mxu1  ;;  %v386_v58 = vmin.f32 %v1325_v51, 0.0  ;;  %v1335_v59 = vpop.f32.mrb[7].mxu0 }
  0xf1   :  { %v483_v56 = vmul.f32 %v1281_v19, %v465_v48  ;;  %v403_v57 = vmul.f32 1.442695, %v383_v49  ;;  %v1337_v60 = vpop.f32.mrb[7].mxu1  ;;  %1077 = vpow2.f32 %v495_v52  ;;  %v466_v62 = vmax.f32 %v1328_v55, 0.0 }
  0xf2   :  { %v481_v61 = vmul.f32 %v1281_v19, %v463_v54  ;;  %1079 = vpow2.f32 %v407_v53  ;;  %v409_v0 = vmul.f32 1.442695, %v386_v58  ;;  %v384_v1 = vmin.f32 %v1335_v59, 0.0 }
  0xf3   :  { %v505_v63 = vmul.f32 1.442695, %v483_v56  ;;  %1081 = vpow2.f32 %v403_v57  ;;  %v484_v4 = vmul.f32 %v1281_v19, %v466_v62  ;;  %v464_v5 = vmax.f32 %v1337_v60, 0.0 }
  0xf4   :  { %v1064_v2 = vpop.eup %1063  ;;  %v501_v3 = vmul.f32 1.442695, %v481_v61  ;;  %v405_v8 = vmul.f32 1.442695, %v384_v1  ;;  %vm370_vm7 = vcmp.gt.f32.partialorder %v1325_v51, 0.0  ;;  %vm368_vm8 = vcmp.gt.f32.partialorder %v1335_v59, 0.0 }
  0xf5   :  { %v1066_v6 = vpop.eup %1065  ;;  %v799_v7 = vadd.f32 -1.0, %v1064_v2  ;;  %1083 = vpow2.f32 %v505_v63  ;;  %v1350_v9 = vpop.f32.mrb[8].mxu0  ;;  %v507_v12 = vmul.f32 1.442695, %v484_v4  ;;  %v482_v13 = vmul.f32 %v1281_v19, %v464_v5 }
  0xf6   :  { %v1068_v10 = vpop.eup %1067  ;;  %v797_v11 = vadd.f32 -1.0, %v1066_v6  ;;  %1085 = vpow2.f32 %v501_v3  ;;  %v1355_v14 = vpop.f32.mrb[8].mxu1  ;;  %v389_v23 = vmin.f32 %v1350_v9, 0.0  ;;  %vm373_vm9 = vcmp.gt.f32.partialorder %v1350_v9, 0.0 }
  0xf7   :  { %v1357_v15 = vpop.f32.mrb[9].mxu0  ;;  %v1070_v17 = vpop.eup %1069  ;;  %v445_v22 = vsel %vm365_vm1, %v1276_v16, %v799_v7  ;;  %v800_v25 = vadd.f32 -1.0, %v1068_v10  ;;  %1087 = vpow2.f32 %v409_v0  ;;  %v503_v45 = vmul.f32 1.442695, %v482_v13 }
  0xf8   :  { %v1363_v27 = vpop.f32.mrb[9].mxu1  ;;  %v1365_v29 = vpop.f32.mrb[10].mxu0  ;;  %v1367_v34 = vmul.f32 %v1070_v17, %v445_v22  ;;  %v623_v35 = vmul.f32 %v1070_v17, %v461_v21  ;;  %v443_v36 = vsel %vm363_vm2, %v1283_v20, %v797_v11  ;;  %1089 = vpow2.f32 %v507_v12 }
  0xf9   :  { %v1072_v30 = vpop.eup %1071  ;;  %v1374_v16 = vpop.f32.mrb[10].mxu1  ;;  %v446_v18 = vsel %vm366_vm3, %v1289_v24, %v800_v25  ;;  %1091 = vpow2.f32 %v405_v8  ;;  %v387_v57 = vmin.f32 %v1357_v15, 0.0  ;;  %v415_v61 = vmul.f32 1.442695, %v389_v23 }
  0xfa   :  { %v1376_v37 = vpop.f32.mrb[11].mxu0  ;;  %v1074_v38 = vpop.eup %1073  ;;  %v1378_v39 = vmul.f32 %v1072_v30, %v443_v36  ;;  %v621_v41 = vmul.f32 %v1072_v30, %v459_v26  ;;  %v639_v49 = vmul.f32 %v1070_v17, %v623_v35  ;;  %v469_v26 = vmax.f32 %v1355_v14, 0.0 }
  0xfb   :  { %v1385_v21 = vpop.f32.mrb[11].mxu1  ;;  %v1076_v42 = vpop.eup %1075  ;;  %v1387_v20 = vmul.f32 %v1074_v38, %v446_v18  ;;  %v624_v44 = vmul.f32 %v1074_v38, %v462_v31  ;;  %1093 = vpow2.f32 %v503_v45  ;;  %v411_v6 = vmul.f32 1.442695, %v387_v57 }
  0xfc   :  { %v798_v52 = vadd.f32 -1.0, %v1076_v42  ;;  %v1078_v53 = vpop.eup %1077  ;;  %v637_v24 = vmul.f32 %v1072_v30, %v621_v41  ;;  %v487_v63 = vmul.f32 %v1281_v19, %v469_v26  ;;  %1095 = vpow2.f32 %v415_v61 }
  0xfd   :  { %v640_v56 = vmul.f32 %v1074_v38, %v624_v44  ;;  %v1080_v58 = vpop.eup %1079  ;;  %v622_v31 = vmul.f32 %v1078_v53, %v460_v40  ;;  %v1403_v0 = vpop.f32.mrb[12].mxu0  ;;  %1097 = vpow2.f32 %v411_v6  ;;  %v467_v22 = vmax.f32 %v1363_v27, 0.0 }
  0xfe   :  { %v444_v28 = vsel %vm364_vm4, %v1299_v32, %v798_v52  ;;  %v1082_v1 = vpop.eup %1081  ;;  %v803_v4 = vadd.f32 -1.0, %v1080_v58  ;;  %v1407_v7 = vpop.f32.mrb[12].mxu1  ;;  %v513_v10 = vmul.f32 1.442695, %v487_v63  ;;  %vm371_vm10 = vcmp.gt.f32.partialorder %v1357_v15, 0.0 }
  0xff   :  { %v925_v2 = vpack.c.bf16 %v640_v56, %v639_v49  ;;  %v1405_v3 = vmul.f32 %v1078_v53, %v444_v28  ;;  %v1409_v8 = vpop.f32.mrb[13].mxu0  ;;  %v1084_v32 = vpop.eup %1083  ;;  %v638_v33 = vmul.f32 %v1078_v53, %v622_v31  ;;  %v801_v40 = vadd.f32 -1.0, %v1082_v1 }
 0x100   :  { %v1411_v11 = vpop.f32.mrb[13].mxu1  ;;  %v1413_v12 = vpop.f32.mrb[14].mxu0  ;;  %v449_v17 = vsel %vm369_vm5, %v1311_v43, %v803_v4  ;;  %v627_v41 = vmul.f32 %v1084_v32, %v465_v48  ;;  %1099 = vpow2.f32 %v513_v10  ;;  %v390_v53 = vmin.f32 %v1365_v29, 0.0 }
 0x101   :  { %v1086_v13 = vpop.eup %1085  ;;  %964 = vst [vmem:[#allocation5 + $0x8] sm:$0xff] %v925_v2   ;;  %v1420_v25 = vpop.f32.mrb[14].mxu1  ;;  %v920_v36 = vpack.c.bf16 %v638_v33, %v637_v24  ;;  %v1424_v38 = vmul.f32 %v1084_v32, %v449_v17  ;;  %v447_v18 = vsel %vm367_vm6, %v1319_v47, %v801_v40  ;;  %v485_v47 = vmul.f32 %v1281_v19, %v467_v22 }
 0x102   :  { %v1422_v30 = vpop.f32.mrb[15].mxu0  ;;  %v1088_v35 = vpop.eup %1087  ;;  %v1431_v44 = vmul.f32 %v1086_v13, %v447_v18  ;;  %v625_v52 = vmul.f32 %v1086_v13, %v463_v54  ;;  %v470_v24 = vmax.f32 %v1374_v16, 0.0  ;;  %v643_v56 = vmul.f32 %v1084_v32, %v627_v41 }
 0x103   :  { %v1429_v42 = vpop.f32.mrb[15].mxu1  ;;  %v1090_v43 = vpop.eup %1089  ;;  %v804_v45 = vadd.f32 -1.0, %v1088_v35  ;;  %921 = vst [vmem:[#allocation5] sm:$0xff] %v920_v36   ;;  %v509_v54 = vmul.f32 1.442695, %v485_v47  ;;  %v468_v4 = vmax.f32 %v1385_v21, 0.0 }
 0x104   :  { %v1092_v49 = vpop.eup %1091  ;;  %v628_v46 = vmul.f32 %v1090_v43, %v466_v62  ;;  %v417_v58 = vmul.f32 1.442695, %v390_v53  ;;  %v488_v28 = vmul.f32 %v1281_v19, %v470_v24  ;;  %v641_v6 = vmul.f32 %v1086_v13, %v625_v52 }
 0x105   :  { %v450_v48 = vsel %vm370_vm7, %v1325_v51, %v804_v45  ;;  %v802_v23 = vadd.f32 -1.0, %v1092_v49  ;;  %v1094_v55 = vpop.eup %1093  ;;  %v388_v51 = vmin.f32 %v1376_v37, 0.0  ;;  %1101 = vpow2.f32 %v509_v54 }
 0x106   :  { %v1445_v57 = vmul.f32 %v1090_v43, %v450_v48  ;;  %v644_v50 = vmul.f32 %v1090_v43, %v628_v46  ;;  %v626_v63 = vmul.f32 %v1094_v55, %v464_v5  ;;  %1103 = vpow2.f32 %v417_v58 }
 0x107   :  { %v448_v62 = vsel %vm368_vm8, %v1335_v59, %v802_v23  ;;  %v515_v1 = vmul.f32 1.442695, %v488_v28  ;;  %v413_v2 = vmul.f32 1.442695, %v388_v51  ;;  %v1096_v59 = vpop.eup %1095  ;;  %v393_v33 = vmin.f32 %v1403_v0, 0.0 }
 0x108   :  { %v935_v31 = vpack.c.bf16 %v644_v50, %v643_v56  ;;  %v1452_v61 = vmul.f32 %v1094_v55, %v448_v62  ;;  %v642_v32 = vmul.f32 %v1094_v55, %v626_v63  ;;  %v473_v40 = vmax.f32 %v1407_v7, 0.0  ;;  %v1098_v10 = vpop.eup %1097 }
 0x109   :  { %v807_v17 = vadd.f32 -1.0, %v1096_v59  ;;  %1105 = vpow2.f32 %v515_v1  ;;  %v486_v60 = vmul.f32 %v1281_v19, %v468_v4  ;;  %v805_v35 = vadd.f32 -1.0, %v1098_v10 }
 0x10a   :  { %966 = vst [vmem:[#allocation5 + $0x18] sm:$0xff] %v935_v31   ;;  %v930_v5 = vpack.c.bf16 %v642_v32, %v641_v6  ;;  %1107 = vpow2.f32 %v413_v2  ;;  %v423_v36 = vmul.f32 1.442695, %v393_v33  ;;  %v1100_v13 = vpop.eup %1099  ;;  %v491_v43 = vmul.f32 %v1281_v19, %v473_v40 }
 0x10b   :  { %v453_v41 = vsel %vm373_vm9, %v1350_v9, %v807_v17  ;;  %v511_v18 = vmul.f32 1.442695, %v486_v60  ;;  %v391_v45 = vmin.f32 %v1409_v8, 0.0  ;;  %v471_v47 = vmax.f32 %v1411_v11, 0.0 }
 0x10c   :  { %965 = vst [vmem:[#allocation5 + $0x10] sm:$0xff] %v930_v5   ;;  %v1468_v49 = vmul.f32 %v1100_v13, %v453_v41  ;;  %1109 = vpow2.f32 %v423_v36  ;;  %v521_v52 = vmul.f32 1.442695, %v491_v43  ;;  %v451_v9 = vsel %vm371_vm10, %v1357_v15, %v805_v35 }
 0x10d   :  { %1111 = vpow2.f32 %v511_v18  ;;  %v419_v46 = vmul.f32 1.442695, %v391_v45  ;;  %vm374_vm11 = vcmp.gt.f32.partialorder %v1365_v29, 0.0  ;;  %v394_v48 = vmin.f32 %v1413_v12, 0.0 }
 0x10e   :  { %v474_v23 = vmax.f32 %v1420_v25, 0.0  ;;  %v631_v53 = vmul.f32 %v1100_v13, %v469_v26  ;;  %1113 = vpow2.f32 %v521_v52  ;;  %v489_v56 = vmul.f32 %v1281_v19, %v471_v47 }
 0x10f   :  { %v392_v50 = vmin.f32 %v1422_v30, 0.0  ;;  %v1102_v54 = vpop.eup %1101  ;;  %1115 = vpow2.f32 %v419_v46  ;;  %v425_v55 = vmul.f32 1.442695, %v394_v48  ;;  %v472_v62 = vmax.f32 %v1429_v42, 0.0 }
 0x110   :  { %v492_v15 = vmul.f32 %v1281_v19, %v474_v23  ;;  %v1104_v58 = vpop.eup %1103  ;;  %v533_v28 = vmul.f32 %v1102_v54, %v451_v9  ;;  %vm372_vm12 = vcmp.gt.f32.partialorder %v1376_v37, 0.0  ;;  %v517_v14 = vmul.f32 1.442695, %v489_v56 }
 0x111   :  { %v421_v26 = vmul.f32 1.442695, %v392_v50  ;;  %v808_v51 = vadd.f32 -1.0, %v1104_v58  ;;  %1117 = vpow2.f32 %v425_v55  ;;  %v490_v63 = vmul.f32 %v1281_v19, %v472_v62 }
 0x112   :  { %v523_v31 = vmul.f32 1.442695, %v492_v15  ;;  %v647_v2 = vmul.f32 %v1100_v13, %v631_v53  ;;  %1119 = vpow2.f32 %v517_v14  ;;  %v880_v59 = vpack.c.bf16 %v1405_v3, %v1378_v39 }
 0x113   :  { %v1106_v1 = vpop.eup %1105  ;;  %v885_v6 = vpack.c.bf16 %v1387_v20, %v1367_v34  ;;  %v454_v33 = vsel %vm374_vm11, %v1365_v29, %v808_v51  ;;  %v519_v17 = vmul.f32 1.442695, %v490_v63  ;;  %v890_v39 = vpack.c.bf16 %v1452_v61, %v1431_v44 }
 0x114   :  { %v1108_v32 = vpop.eup %1107  ;;  %v632_v10 = vmul.f32 %v1106_v1, %v470_v24  ;;  %1121 = vpow2.f32 %v523_v31  ;;  %v536_v19 = vmul.f32 %v1106_v1, %v454_v33  ;;  %881 = vst [vmem:[#allocation3] sm:$0xff] %v880_v59   ;;  %v629_v34 = vmul.f32 %v1102_v54, %v467_v22 }
 0x115   :  { %v806_v60 = vadd.f32 -1.0, %v1108_v32  ;;  %1123 = vpow2.f32 %v421_v26  ;;  %957 = vst [vmem:[#allocation3 + $0x8] sm:$0xff] %v885_v6   ;;  %v895_v29 = vpack.c.bf16 %v1445_v57, %v1424_v38  ;;  %958 = vst [vmem:[#allocation3 + $0x10] sm:$0xff] %v890_v39   ;;  %vm377_vm13 = vcmp.gt.f32.partialorder %v1403_v0, 0.0 }
 0x116   :  { %v1110_v3 = vpop.eup %1109  ;;  %v648_v20 = vmul.f32 %v1106_v1, %v632_v10  ;;  %1125 = vpow2.f32 %v519_v17  ;;  %v905_v35 = vpack.c.bf16 %v536_v19, %v1468_v49  ;;  %v645_v61 = vmul.f32 %v1102_v54, %v629_v34 }
 0x117   :  { %v1112_v16 = vpop.eup %1111  ;;  %v452_v24 = vsel %vm372_vm12, %v1376_v37, %v806_v60  ;;  %v811_v5 = vadd.f32 -1.0, %v1110_v3  ;;  %959 = vst [vmem:[#allocation3 + $0x18] sm:$0xff] %v895_v29   ;;  %vm375_vm14 = vcmp.gt.f32.partialorder %v1409_v8, 0.0  ;;  %vm378_vm15 = vcmp.gt.f32.partialorder %v1413_v12, 0.0 }
 0x118   :  { %v945_v36 = vpack.c.bf16 %v648_v20, %v647_v2  ;;  %v534_v44 = vmul.f32 %v1112_v16, %v452_v24  ;;  %v630_v27 = vmul.f32 %v1112_v16, %v468_v4  ;;  %v1114_v22 = vpop.eup %1113  ;;  %961 = vst [vmem:[#allocation3 + $0x28] sm:$0xff] %v905_v35   ;;  %vm376_vm0 = vcmp.gt.f32.partialorder %v1422_v30, 0.0 }
 0x119   :  { %v457_v38 = vsel %vm377_vm13, %v1403_v0, %v811_v5  ;;  %v1116_v57 = vpop.eup %1115  ;;  %v635_v4 = vmul.f32 %v1114_v22, %v473_v40 }
 0x11a   :  { %968 = vst [vmem:[#allocation5 + $0x28] sm:$0xff] %v945_v36   ;;  %v646_v37 = vmul.f32 %v1112_v16, %v630_v27  ;;  %v539_v13 = vmul.f32 %v1114_v22, %v457_v38  ;;  %v900_v41 = vpack.c.bf16 %v534_v44, %v533_v28  ;;  %v809_v18 = vadd.f32 -1.0, %v1116_v57 }
 0x11b   :  { %v1118_v43 = vpop.eup %1117  ;;  %v651_v54 = vmul.f32 %v1114_v22, %v635_v4 }
 0x11c   :  { %v940_v45 = vpack.c.bf16 %v646_v37, %v645_v61  ;;  %960 = vst [vmem:[#allocation3 + $0x20] sm:$0xff] %v900_v41   ;;  %v1120_v21 = vpop.eup %1119  ;;  %v455_v49 = vsel %vm375_vm14, %v1409_v8, %v809_v18  ;;  %v812_v0 = vadd.f32 -1.0, %v1118_v43 }
 0x11d   :  { %v537_v46 = vmul.f32 %v1120_v21, %v455_v49  ;;  %v633_v48 = vmul.f32 %v1120_v21, %v471_v47 }
 0x11e   :  { %v1122_v52 = vpop.eup %1121  ;;  %967 = vst [vmem:[#allocation5 + $0x20] sm:$0xff] %v940_v45   ;;  %v458_v53 = vsel %vm378_vm15, %v1413_v12, %v812_v0 }
 0x11f   :  { %v1124_v9 = vpop.eup %1123  ;;  %v636_v56 = vmul.f32 %v1122_v52, %v474_v23  ;;  %v540_v7 = vmul.f32 %v1122_v52, %v458_v53  ;;  %v649_v11 = vmul.f32 %v1120_v21, %v633_v48 }
 0x120   :  { %v1126_v50 = vpop.eup %1125  ;;  %v810_v40 = vadd.f32 -1.0, %v1124_v9 }
 0x121   :  { %v652_v8 = vmul.f32 %v1122_v52, %v636_v56  ;;  %v634_v55 = vmul.f32 %v1126_v50, %v472_v62  ;;  %v915_v58 = vpack.c.bf16 %v540_v7, %v539_v13 }
 0x122   :  { %v456_v15 = vsel %vm376_vm0, %v1422_v30, %v810_v40 }
 0x123   :  { %v955_v12 = vpack.c.bf16 %v652_v8, %v651_v54  ;;  %v538_v47 = vmul.f32 %v1126_v50, %v456_v15  ;;  %v650_v25 = vmul.f32 %v1126_v50, %v634_v55  ;;  %963 = vst [vmem:[#allocation3 + $0x38] sm:$0xff] %v915_v58  }
 0x125   :  { %970 = vst [vmem:[#allocation5 + $0x38] sm:$0xff] %v955_v12   ;;  %v910_v23 = vpack.c.bf16 %v538_v47, %v537_v46  ;;  %v950_v28 = vpack.c.bf16 %v650_v25, %v649_v11 }
 0x127   :  { %969 = vst [vmem:[#allocation5 + $0x30] sm:$0xff] %v950_v28   ;;  %962 = vst [vmem:[#allocation3 + $0x30] sm:$0xff] %v910_v23  }
 0x128   :  { %1138 = shalt.err (!%p1135_p4)
}
 0x129   :  { %s1139_s6 = scalar_lea.hbm %s1562_s4, 1024 }
 0x12a   :  { %p1140_p5 = scmp.ne.s32.totalorder %s1562_s4, %s1139_s6  ;;  %p1143_p6 = scmp.lt.u32.totalorder %s1139_s6, %s1562_s4 }
 0x12c   :  { %p1145_p7 = pnand %p1143_p6, %p1140_p5 }
 0x12e   :  { %1148 = shalt.err (!%p1145_p7)
}
 0x12f   :  { %s1177_s2 = smov 64   ;;  %s1178_s11 = smov 4  }
 0x130   :  { %744 = dma.vmem_to_hbm [thread:$0]  %s739_s1, 1024, %s1562_s4, [#allocation4], %s1177_s2, %s1177_s2, %s1178_s11  }
 0x131   :  { %s1149_s3 = scalar_lea.vmem %s1527_s27, 1024  ;;  %p1154_p9 = scmp.lt.s32.totalorder %s1527_s27, %s1527_s27 }
 0x132   :  { %p1150_p8 = scmp.ne.s32.totalorder %s1527_s27, %s1149_s3  ;;  %p1155_p10 = scmp.lt.s32.totalorder %s1149_s3, %s1149_s3 }
 0x134   :  { %p1156_p11 = por %p1155_p10, %p1154_p9 }
 0x136   :  { %p1157_p12 = pnand %p1156_p11, %p1150_p8 }
 0x138   :  { %1160 = shalt.err (!%p1157_p12)
}
 0x139   :  { %s1161_s16 = scalar_lea.hbm %s1563_s5, 1024 }
 0x13a   :  { %p1162_p13 = scmp.ne.s32.totalorder %s1563_s5, %s1161_s16  ;;  %p1165_p0 = scmp.lt.u32.totalorder %s1161_s16, %s1563_s5 }
 0x13c   :  { %p1167_p1 = pnand %p1165_p0, %p1162_p13 }
 0x13e   :  { %1170 = shalt.err (!%p1167_p1)
}
 0x13f   :  { %756 = dma.vmem_to_hbm [thread:$0]  %s1527_s27, 1024, %s1563_s5, [#allocation6], %s1177_s2, %s1177_s2, %s1178_s11  }
 0x140   :  { %1171 = dma.done.wait [#allocation4], 1024  }
 0x141   :  { %1172 = vsyncadd [#allocation4], 4294966272 }
 0x142   :  { %1173 = dma.done.wait [#allocation6], 1024  }
 0x143   :  { %1174 = vsyncadd [#allocation6], 4294966272 }
 0x144   :  { %763 = vsyncpa [#allocation4], 1 }
 0x145   :  { %764 = vsyncpa [#allocation6], 1 }

</bundles_post_ra>
